<compile_context>
chip_gen: v7x
topology: tpu7x:2x2x1
jax: 0.10.0
libtpu: 0.0.40
codegen_flags: <defaults>
</compile_context>

<pallas_src>
import jax
import jax.numpy as jnp
from jax.experimental import pallas as pl
from jax.experimental.pallas import tpu as pltpu


def _cdiv(a, b):
    return (a + b - 1) // b


def _round_up(a, b):
    return _cdiv(a, b) * b


# -----------------------------------------------------------------------------
# Kernel: one (tile_m, DP) lane-dense row tile of the packed input.
#   h = relu(x @ W1 + b1);  w = h @ W2' + b2'   with W2' = lr*W2, b2' = lr*b2 + 1
#   out = x * w                                 (== lr * x * mlp(x) + x)
# MXU operands are bf16 (weights pre-cast host-side, x/h cast in-kernel);
# accumulation and the elementwise epilogue stay f32.
# -----------------------------------------------------------------------------
def selfcorr_kernel(x_ref, w1_ref, b1_ref, w2_ref, b2_ref, o_ref):
    xf = x_ref[...]
    if xf.dtype != jnp.float32:
        xf = xf.astype(jnp.float32)
    mx_dtype = w1_ref.dtype
    h = jnp.dot(xf.astype(mx_dtype), w1_ref[...],
                preferred_element_type=jnp.float32) + b1_ref[...]
    h = jnp.maximum(h, 0.0)
    w = jnp.dot(h.astype(mx_dtype), w2_ref[...],
                preferred_element_type=jnp.float32) + b2_ref[...]
    out = xf * w
    o_ref[...] = out if out.dtype == o_ref.dtype else out.astype(o_ref.dtype)


# -----------------------------------------------------------------------------
# Host-side parameter packing (run ONCE per parameter set, not per call).
# Weights are given already transposed so y = x @ W + b.
# -----------------------------------------------------------------------------
def pack_selfcorr_params(w1, b1, w2, b2, lr, *, matmul_dtype=jnp.bfloat16):
    D = int(w1.shape[0])

    # lane-dense geometry: fold `pack` rows per 128-lane row, or pad features
    if D % 128 == 0:
        pack, d_pad = 1, D
    elif D < 128 and 128 % D == 0:
        pack, d_pad = 128 // D, D
    else:
        pack, d_pad = 1, _round_up(D, 128)
    DP = d_pad * pack

    lr = jnp.float32(lr)
    w1f = jnp.asarray(w1, jnp.float32)
    w2f = jnp.asarray(w2, jnp.float32) * lr          # fold lambda into layer 2
    b1f = jnp.asarray(b1, jnp.float32)
    b2f = jnp.asarray(b2, jnp.float32) * lr + 1.0    # ... and the "+ x" residual

    if d_pad != D:  # zero-pad feature dim so loads/stores stay 128-lane dense
        pad = d_pad - D
        w1f = jnp.pad(w1f, ((0, pad), (0, pad)))
        w2f = jnp.pad(w2f, ((0, pad), (0, pad)))
        b1f = jnp.pad(b1f, ((0, pad),))
        b2f = jnp.pad(b2f, ((0, pad),))

    if pack > 1:   # block-diagonal weights / lane-tiled biases
        eye = jnp.eye(pack, dtype=jnp.float32)
        w1p = jnp.kron(eye, w1f)
        w2p = jnp.kron(eye, w2f)
        b1p = jnp.tile(b1f.reshape(1, d_pad), (1, pack))
        b2p = jnp.tile(b2f.reshape(1, d_pad), (1, pack))
    else:
        w1p, w2p = w1f, w2f
        b1p, b2p = b1f.reshape(1, d_pad), b2f.reshape(1, d_pad)

    return dict(D=D, pack=pack, d_pad=d_pad, DP=DP,
                w1=w1p.astype(matmul_dtype), b1=b1p,
                w2=w2p.astype(matmul_dtype), b2=b2p)


# -----------------------------------------------------------------------------
# SelfCorrelation forward.  x: (N, I, D).  Returns (N, I, D).
# -----------------------------------------------------------------------------
def self_correlation(x, params, *, max_tile_rows=4096, vmem_fraction=0.6):
    N, I, D = x.shape
    assert D == params["D"]
    pack, d_pad, DP = params["pack"], params["d_pad"], params["DP"]
    M = N * I
    dtype = x.dtype

    # --- reshape to lane-dense packed rows; pad only when strictly needed ----
    x_flat = x.reshape(M, D)
    if d_pad != D:
        x_flat = jnp.pad(x_flat, ((0, 0), (0, d_pad - D)))
    M_pad = _round_up(M, pack)
    if M_pad != M:
        x_flat = jnp.pad(x_flat, ((0, M_pad - M), (0, 0)))
    rows = M_pad // pack
    x_packed = x_flat.reshape(rows, DP)

    # --- row tile from a VMEM budget; keep >= 2 grid steps for large inputs --
    try:
        vmem_capacity = int(pltpu.get_tpu_info().vmem_capacity_bytes)
    except Exception:  # be defensive; assume the smallest (v7x per-TC) VMEM
        vmem_capacity = 64 * 1024 * 1024
    vmem_budget = int(vmem_capacity * vmem_fraction)

    w_bytes = 2 * (2 * DP * DP * 2) + 2 * (2 * DP * 4)   # dbl-buffered bf16 W + f32 b
    row_bytes = 2 * 2 * DP * 4 + 8 * DP                  # x/out dbl-buf f32 + temporaries
    cap_rows = max(8, ((vmem_budget - w_bytes) // row_bytes) // 8 * 8)

    if rows <= 8:
        tile_m = rows                                    # full-dim block (allowed)
    else:
        tile_m = max(8, min(max_tile_rows, cap_rows, _round_up(rows, 8)) // 8 * 8)
        # Never collapse a big problem onto a single grid step: both v7x TCs get
        # work and DMA/compute/writeback overlap stays alive.
        if rows >= 2048 and _cdiv(rows, tile_m) < 2:
            tile_m = _round_up(_cdiv(rows, 2), 8)
    grid_rows = _cdiv(rows, tile_m)

    need = (2 * 2 * tile_m * DP * 4      # x + out tiles, double-buffered f32
            + tile_m * DP * 8            # in-kernel temporaries (h, bf16 casts)
            + w_bytes)
    vmem_limit = int(min(max(int(need * 1.5), 8 * 1024 * 1024),
                         int(vmem_capacity * 0.75)))

    out_packed = pl.pallas_call(
        selfcorr_kernel,
        out_shape=jax.ShapeDtypeStruct((rows, DP), dtype),
        grid_spec=pltpu.PrefetchScalarGridSpec(
            num_scalar_prefetch=0,
            grid=(grid_rows,),
            in_specs=[
                pl.BlockSpec((tile_m, DP), lambda i: (i, 0)),   # x tile (lane-dense)
                pl.BlockSpec((DP, DP), lambda i: (0, 0)),       # W1 (block-diag, bf16)
                pl.BlockSpec((1, DP), lambda i: (0, 0)),        # b1 (lane-tiled, f32)
                pl.BlockSpec((DP, DP), lambda i: (0, 0)),       # W2' = lr*W2 (bf16)
                pl.BlockSpec((1, DP), lambda i: (0, 0)),        # b2' = lr*b2 + 1 (f32)
            ],
            out_specs=pl.BlockSpec((tile_m, DP), lambda i: (i, 0)),
        ),
        compiler_params=pltpu.CompilerParams(
            dimension_semantics=("parallel",),
            vmem_limit_bytes=vmem_limit),
    )(x_packed, params["w1"], params["b1"], params["w2"], params["b2"])

    out_flat = out_packed.reshape(M_pad, d_pad)
    if M_pad != M or d_pad != D:
        out_flat = out_flat[:M, :D]
    return out_flat.reshape(N, I, D)


# -----------------------------------------------------------------------------
# References
# -----------------------------------------------------------------------------
def self_correlation_ref(x, w1, b1, w2, b2, lr):
    """Pure f32 reference (exact PyTorch semantics)."""
    N, I, D = x.shape
    xf = x.reshape(-1, D).astype(jnp.float32)
    h = jnp.maximum(xf @ w1 + b1, 0.0)
    w = h @ w2 + b2
    return (lr * xf * w + xf).reshape(N, I, D)


def self_correlation_ref_bf16(x, w1, b1, w2, b2, lr):
    """Reference mirroring the kernel's bf16-MXU / f32-accumulate numerics."""
    N, I, D = x.shape
    xf = x.reshape(-1, D).astype(jnp.float32)
    w1b = jnp.asarray(w1, jnp.float32).astype(jnp.bfloat16)
    w2b = (jnp.float32(lr) * jnp.asarray(w2, jnp.float32)).astype(jnp.bfloat16)
    h = jnp.dot(xf.astype(jnp.bfloat16), w1b, preferred_element_type=jnp.float32) + b1
    h = jnp.maximum(h, 0.0)
    w = (jnp.dot(h.astype(jnp.bfloat16), w2b, preferred_element_type=jnp.float32)
         + (jnp.float32(lr) * b2 + 1.0))
    return (xf * w).reshape(N, I, D)


if __name__ == "__main__":
    # Small shapes consistent with the module: N point clouds, I points, D feature dim.
    N, I, D = 2, 64, 32
    key = jax.random.PRNGKey(0)
    kx, k1, kb1, k2, kb2 = jax.random.split(key, 5)

    x = jax.random.normal(kx, (N, I, D), dtype=jnp.float32)
    # Deterministic MLP parameters (Linear(D,D) -> ReLU -> Linear(D,D)),
    # stored already transposed so the kernel computes x @ W + b.
    w1 = jax.random.normal(k1, (D, D), dtype=jnp.float32) * (1.0 / jnp.sqrt(D))
    b1 = jax.random.normal(kb1, (D,), dtype=jnp.float32) * 0.01
    w2 = jax.random.normal(k2, (D, D), dtype=jnp.float32) * (1.0 / jnp.sqrt(D))
    b2 = jax.random.normal(kb2, (D,), dtype=jnp.float32) * 0.01
    learning_rate = 1.0  # lambda parameter, initial value as in the module

    params = pack_selfcorr_params(w1, b1, w2, b2, learning_rate)   # once per param set
    out = self_correlation(x, params)
    out = jax.block_until_ready(out)

    assert out.shape == (N, I, D)
    ref_b16 = self_correlation_ref_bf16(x, w1, b1, w2, b2, learning_rate)
    ref_f32 = self_correlation_ref(x, w1, b1, w2, b2, learning_rate)
    # Tight check against the bf16-mimicking reference; loose check against the pure
    # f32 reference (bf16 MXU operands introduce ~1e-2 relative error on Weight).
    assert jnp.allclose(out, ref_b16, atol=2e-3, rtol=2e-3)
    assert jnp.allclose(out, ref_f32, atol=5e-2, rtol=5e-2)

    print("KERNEL_OK")
</pallas_src>

<mosaic_0001>
module attributes {stable_mosaic.version = 11 : i64} {
  func.func @selfcorr_kernel(%arg0: i32, %arg1: memref<32x128xf32, #tpu.memory_space<vmem>>, %arg2: memref<128x128xbf16, #tpu.memory_space<vmem>>, %arg3: memref<1x128xf32, #tpu.memory_space<vmem>>, %arg4: memref<128x128xbf16, #tpu.memory_space<vmem>>, %arg5: memref<1x128xf32, #tpu.memory_space<vmem>>, %arg6: memref<32x128xf32, #tpu.memory_space<vmem>>) attributes {dimension_semantics = [#tpu.dimension_semantics<parallel>], iteration_bounds = array<i64: 1>, scalar_prefetch = 0 : i64, scratch_operands = 0 : i64, tpu.core_type = #tpu.core_type<tc>, window_params = [{transform_indices = @transform_0, window_bounds = array<i64: 32, 128>}, {pipeline_mode = #tpu.pipeline_mode<synchronous>, transform_indices = @transform_1, window_bounds = array<i64: 128, 128>}, {pipeline_mode = #tpu.pipeline_mode<synchronous>, transform_indices = @transform_2, window_bounds = array<i64: 1, 128>}, {pipeline_mode = #tpu.pipeline_mode<synchronous>, transform_indices = @transform_3, window_bounds = array<i64: 128, 128>}, {pipeline_mode = #tpu.pipeline_mode<synchronous>, transform_indices = @transform_4, window_bounds = array<i64: 1, 128>}, {transform_indices = @transform_5, window_bounds = array<i64: 32, 128>}]} {
    %c0 = arith.constant 0 : index
    %c0_0 = arith.constant 0 : index
    %0 = vector.load %arg1[%c0, %c0_0] : memref<32x128xf32, #tpu.memory_space<vmem>>, vector<32x128xf32>
    %1 = arith.truncf %0 : vector<32x128xf32> to vector<32x128xbf16>
    %c0_1 = arith.constant 0 : index
    %c0_2 = arith.constant 0 : index
    %2 = vector.load %arg2[%c0_1, %c0_2] : memref<128x128xbf16, #tpu.memory_space<vmem>>, vector<128x128xbf16>
    %cst = arith.constant dense<0.000000e+00> : vector<32x128xf32>
    %3 = tpu.matmul %1, %2, %cst {dimension_numbers = #tpu.dot_dimension_numbers<[1], [0], [0], [1], [0, 0, 1, 1], [], []>} : vector<32x128xbf16>, vector<128x128xbf16>, vector<32x128xf32> -> vector<32x128xf32>
    %c0_3 = arith.constant 0 : index
    %c0_4 = arith.constant 0 : index
    %4 = vector.load %arg3[%c0_3, %c0_4] : memref<1x128xf32, #tpu.memory_space<vmem>>, vector<1x128xf32>
    %5 = vector.broadcast %4 : vector<1x128xf32> to vector<32x128xf32>
    %6 = arith.addf %3, %5 : vector<32x128xf32>
    %cst_5 = arith.constant 0.000000e+00 : f32
    %7 = vector.broadcast %cst_5 : f32 to vector<32x128xf32>
    %8 = arith.maximumf %6, %7 : vector<32x128xf32>
    %9 = arith.truncf %8 : vector<32x128xf32> to vector<32x128xbf16>
    %c0_6 = arith.constant 0 : index
    %c0_7 = arith.constant 0 : index
    %10 = vector.load %arg4[%c0_6, %c0_7] : memref<128x128xbf16, #tpu.memory_space<vmem>>, vector<128x128xbf16>
    %cst_8 = arith.constant dense<0.000000e+00> : vector<32x128xf32>
    %11 = tpu.matmul %9, %10, %cst_8 {dimension_numbers = #tpu.dot_dimension_numbers<[1], [0], [0], [1], [0, 0, 1, 1], [], []>} : vector<32x128xbf16>, vector<128x128xbf16>, vector<32x128xf32> -> vector<32x128xf32>
    %c0_9 = arith.constant 0 : index
    %c0_10 = arith.constant 0 : index
    %12 = vector.load %arg5[%c0_9, %c0_10] : memref<1x128xf32, #tpu.memory_space<vmem>>, vector<1x128xf32>
    %13 = vector.broadcast %12 : vector<1x128xf32> to vector<32x128xf32>
    %14 = arith.addf %11, %13 : vector<32x128xf32>
    %15 = arith.mulf %0, %14 : vector<32x128xf32>
    %c0_11 = arith.constant 0 : index
    %c0_12 = arith.constant 0 : index
    %16 = vector.load %arg6[%c0_11, %c0_12] : memref<32x128xf32, #tpu.memory_space<vmem>>, vector<32x128xf32>
    tpu.vector_store %arg6[%c0_11, %c0_12], %15 {strides = array<i32>} : memref<32x128xf32, #tpu.memory_space<vmem>>, vector<32x128xf32>,
    return
  }
  func.func @transform_0(%arg0: i32) -> (i32, i32) {
    %c0_i32 = arith.constant 0 : i32
    %c0_i32_0 = arith.constant 0 : i32
    return %arg0, %c0_i32 : i32, i32
  }
  func.func @transform_1(%arg0: i32) -> (i32, i32) {
    %c0_i32 = arith.constant 0 : i32
    %c0_i32_0 = arith.constant 0 : i32
    %c0_i32_1 = arith.constant 0 : i32
    return %c0_i32, %c0_i32_0 : i32, i32
  }
  func.func @transform_2(%arg0: i32) -> (i32, i32) {
    %c0_i32 = arith.constant 0 : i32
    %c0_i32_0 = arith.constant 0 : i32
    %c0_i32_1 = arith.constant 0 : i32
    return %c0_i32, %c0_i32_0 : i32, i32
  }
  func.func @transform_3(%arg0: i32) -> (i32, i32) {
    %c0_i32 = arith.constant 0 : i32
    %c0_i32_0 = arith.constant 0 : i32
    %c0_i32_1 = arith.constant 0 : i32
    return %c0_i32, %c0_i32_0 : i32, i32
  }
  func.func @transform_4(%arg0: i32) -> (i32, i32) {
    %c0_i32 = arith.constant 0 : i32
    %c0_i32_0 = arith.constant 0 : i32
    %c0_i32_1 = arith.constant 0 : i32
    return %c0_i32, %c0_i32_0 : i32, i32
  }
  func.func @transform_5(%arg0: i32) -> (i32, i32) {
    %c0_i32 = arith.constant 0 : i32
    %c0_i32_0 = arith.constant 0 : i32
    return %arg0, %c0_i32 : i32, i32
  }
}

</mosaic_0001>

<bundles_post_ra>
// kernel: tpu_custom_call.1
= control target key start
LH: loop header
LB: loop body
LE: loop exit
PB: predicated region body
PF: predicated region fallthrough
CT: control target
= control target key end

     0   :  { %10 = vsyncpa [#allocation3], 0  ;;  %s649_s0 = inlined_call_operand.hbm [shape: f32[32,128], index: 0, kind: input, shape index: {}]   ;;  %s650_s1 = inlined_call_operand.hbm [shape: bf16[128,128], index: 1, kind: input, shape index: {}]   ;;  %s651_s2 = inlined_call_operand.vmem [shape: f32[1,128], index: 2, kind: input, shape index: {}]   ;;  %s652_s3 = inlined_call_operand.hbm [shape: bf16[128,128], index: 3, kind: input, shape index: {}]   ;;  %s653_s4 = inlined_call_operand.vmem [shape: f32[1,128], index: 4, kind: input, shape index: {}]   ;;  %s654_s5 = inlined_call_operand.hbm [shape: f32[32,128], index: 5, kind: output, shape index: {}]  }
   0x1   :  { %11 = vsyncpa [#allocation6], 0 }
   0x2   :  { %12 = vsyncpa [#allocation4], 0  ;;  %s537_s18 = smov [#allocation5]   ;;  %s443_s22 = scalar_lea.hbm %s650_s1, 1024 }
   0x3   :  { %s30_s19 = sshll.u32 %s537_s18, 4  ;;  %p444_p0 = scmp.ne.s32.totalorder %s650_s1, %s443_s22  ;;  %s31_s19 = int_to_ptr.vmem [resolvable:$true] %s30_s19 }
   0x4   :  { %p447_p1 = scmp.lt.u32.totalorder %s443_s22, %s650_s1 }
   0x6   :  { %p449_p2 = pnand %p447_p1, %p444_p0 }
   0x8   :  { %452 = shalt.err (!%p449_p2)
}
   0x9   :  { %s453_s27 = scalar_lea.vmem %s31_s19, 1024  ;;  %p458_p4 = scmp.lt.s32.totalorder %s31_s19, %s31_s19 }
   0xa   :  { %p454_p3 = scmp.ne.s32.totalorder %s31_s19, %s453_s27  ;;  %p459_p5 = scmp.lt.s32.totalorder %s453_s27, %s453_s27 }
   0xc   :  { %p460_p6 = por %p459_p5, %p458_p4 }
   0xe   :  { %p461_p7 = pnand %p460_p6, %p454_p3 }
  0x10   :  { %464 = shalt.err (!%p461_p7)
}
  0x11   :  { %s538_s28 = smov 64   ;;  %s539_s29 = smov 4  }
  0x12   :  { %36 = dma.hbm_to_vmem [thread:$0]  %s650_s1, 1024, %s31_s19, [#allocation6], %s538_s28, %s538_s28, %s539_s29  }
  0x13   :  { %s540_s7 = smov [#allocation2]   ;;  %s465_s11 = scalar_lea.hbm %s649_s0, 512 }
  0x14   :  { %s18_s8 = sshll.u32 %s540_s7, 4  ;;  %p466_p8 = scmp.ne.s32.totalorder %s649_s0, %s465_s11  ;;  %s19_s8 = int_to_ptr.vmem [resolvable:$true] %s18_s8 }
  0x15   :  { %p469_p9 = scmp.lt.u32.totalorder %s465_s11, %s649_s0 }
  0x17   :  { %p471_p10 = pnand %p469_p9, %p466_p8 }
  0x19   :  { %474 = shalt.err (!%p471_p10)
}
  0x1a   :  { %s475_s16 = scalar_lea.vmem %s19_s8, 512  ;;  %p480_p12 = scmp.lt.s32.totalorder %s19_s8, %s19_s8 }
  0x1b   :  { %p476_p11 = scmp.ne.s32.totalorder %s19_s8, %s475_s16  ;;  %p481_p13 = scmp.lt.s32.totalorder %s475_s16, %s475_s16 }
  0x1d   :  { %p482_p0 = por %p481_p13, %p480_p12 }
  0x1f   :  { %p483_p1 = pnand %p482_p0, %p476_p11 }
  0x21   :  { %486 = shalt.err (!%p483_p1)
}
  0x22   :  { %s541_s1 = smov 128   ;;  %s542_s17 = smov 8  }
  0x23   :  { %24 = dma.hbm_to_vmem [thread:$0]  %s649_s0, 512, %s19_s8, [#allocation3], %s541_s1, %s541_s1, %s542_s17  }
  0x24   :  { %s543_s20 = smov [#allocation7]   ;;  %s487_s24 = scalar_lea.hbm %s652_s3, 1024 }
  0x25   :  { %s44_s21 = sshll.u32 %s543_s20, 4  ;;  %p488_p2 = scmp.ne.s32.totalorder %s652_s3, %s487_s24  ;;  %s45_s21 = int_to_ptr.vmem [resolvable:$true] %s44_s21 }
  0x26   :  { %p491_p3 = scmp.lt.u32.totalorder %s487_s24, %s652_s3 }
  0x28   :  { %p493_p4 = pnand %p491_p3, %p488_p2 }
  0x2a   :  { %496 = shalt.err (!%p493_p4)
}
  0x2b   :  { %s497_s6 = scalar_lea.vmem %s45_s21, 1024  ;;  %p502_p6 = scmp.lt.s32.totalorder %s45_s21, %s45_s21 }
  0x2c   :  { %p498_p5 = scmp.ne.s32.totalorder %s45_s21, %s497_s6  ;;  %p503_p7 = scmp.lt.s32.totalorder %s497_s6, %s497_s6 }
  0x2e   :  { %p504_p8 = por %p503_p7, %p502_p6 }
  0x30   :  { %p505_p9 = pnand %p504_p8, %p498_p5 }
  0x32   :  { %508 = shalt.err (!%p505_p9)
}
  0x33   :  { %50 = dma.hbm_to_vmem [thread:$0]  %s652_s3, 1024, %s45_s21, [#allocation6], %s538_s28, %s538_s28, %s539_s29  }
  0x34   :  { %531 = dma.done.wait [#allocation3], 512  }
  0x35   :  { %532 = vsyncadd [#allocation3], 4294966784 }
  0x36   :  { %533 = dma.done.wait [#allocation6], 2048  }
  0x37   :  { %534 = vsyncadd [#allocation6], 4294965248  ;;  %v427_v0 = vld [vmem:[#allocation5] sm:$0xff]   ;;  %v428_v1 = vld [vmem:[#allocation5 + $0x8] sm:$0xff]  }
  0x38   :  { %379 = vmatprep.subr.bf16.mxu0 %v427_v0  ;;  %v429_v2 = vld [vmem:[#allocation5 + $0x10] sm:$0xff]   ;;  %v430_v3 = vld [vmem:[#allocation5 + $0x18] sm:$0xff]   ;;  %v620_v4 = vld [vmem:[#allocation2] sm:$0xff] }
  0x39   :  { %380 = vmatpush3.bf16.msra.mxu0 %v427_v0  ;;  %v622_v5 = vld [vmem:[#allocation2 + $0x8] sm:$0xff]  ;;  %v435_v7 = vld [vmem:[#allocation7] sm:$0xff]   ;;  %v437_v10 = vld [vmem:[#allocation7 + $0x10] sm:$0xff]  }
  0x3a   :  { %381 = vmatprep.subr.bf16.mxu0 %v428_v1  ;;  %v67_v6 = vpack.c.bf16 %v622_v5, %v620_v4  ;;  %v436_v8 = vld [vmem:[#allocation7 + $0x8] sm:$0xff]   ;;  %v431_v9 = vld [vmem:[#allocation5 + $0x20] sm:$0xff]   ;;  %399 = vmatprep.subr.bf16.mxu1 %v435_v7  ;;  %v438_v12 = vld [vmem:[#allocation7 + $0x18] sm:$0xff]  }
  0x3b   :  { %400 = vmatpush3.bf16.msra.mxu1 %v435_v7  ;;  %v432_v11 = vld [vmem:[#allocation5 + $0x28] sm:$0xff]   ;;  %v433_v13 = vld [vmem:[#allocation5 + $0x30] sm:$0xff]   ;;  %v439_v14 = vld [vmem:[#allocation7 + $0x20] sm:$0xff]  }
  0x3c   :  { %395 = vmatprep.mubr.bf16.mxu0 %v67_v6  ;;  %401 = vmatprep.subr.bf16.mxu1 %v436_v8  ;;  %v434_v15 = vld [vmem:[#allocation5 + $0x38] sm:$0xff]   ;;  %v440_v16 = vld [vmem:[#allocation7 + $0x28] sm:$0xff]   ;;  %v65_v17 = vld [vmem:[#allocation2 + $0x10] sm:$0xff] }
  0x3d   :  { %382 = vmatpush3.bf16.msra.mxu0 %v428_v1  ;;  %v66_v18 = vld [vmem:[#allocation2 + $0x18] sm:$0xff]  ;;  %v441_v20 = vld [vmem:[#allocation7 + $0x30] sm:$0xff]   ;;  %v341_v22 = vld [vmem:[%s651_s2] ss:$0 sm:$0xff]  ;;  %s544_s2 = smov [#allocation8]  }
  0x3e   :  { %383 = vmatprep.subr.bf16.mxu0 %v429_v2  ;;  %v68_v19 = vpack.c.bf16 %v66_v18, %v65_v17  ;;  %v442_v21 = vld [vmem:[#allocation7 + $0x38] sm:$0xff]   ;;  %v350_v37 = vld [vmem:[%s653_s4] ss:$0 sm:$0xff]  ;;  %s328_s9 = sshll.u32 %s544_s2, 4  ;;  %s329_s9 = int_to_ptr.vmem [resolvable:$true] %s328_s9 }
  0x3f   :  { %402 = vmatpush3.bf16.msra.mxu1 %v436_v8  ;;  %s509_s4 = scalar_lea.vmem %s329_s9, 512  ;;  %p514_p11 = scmp.lt.s32.totalorder %s329_s9, %s329_s9 }
  0x40   :  { %403 = vmatprep.subr.bf16.mxu1 %v437_v10  ;;  %p510_p10 = scmp.ne.s32.totalorder %s329_s9, %s509_s4  ;;  %p515_p12 = scmp.lt.s32.totalorder %s509_s4, %s509_s4 }
  0x41   :  { %384 = vmatpush3.bf16.msra.mxu0 %v429_v2 }
  0x42   :  { %385 = vmatprep.subr.bf16.mxu0 %v430_v3  ;;  %p516_p13 = por %p515_p12, %p514_p11 }
  0x43   :  { %404 = vmatpush3.bf16.msra.mxu1 %v437_v10 }
  0x44   :  { %405 = vmatprep.subr.bf16.mxu1 %v438_v12  ;;  %p517_p0 = pnand %p516_p13, %p510_p10 }
  0x45   :  { %386 = vmatpush3.bf16.msra.mxu0 %v430_v3 }
  0x46   :  { %387 = vmatprep.subr.bf16.mxu0 %v431_v9 }
  0x47   :  { %406 = vmatpush3.bf16.msra.mxu1 %v438_v12 }
  0x48   :  { %407 = vmatprep.subr.bf16.mxu1 %v439_v14 }
  0x49   :  { %388 = vmatpush3.bf16.msra.mxu0 %v431_v9 }
  0x4a   :  { %389 = vmatprep.subr.bf16.mxu0 %v432_v11 }
  0x4b   :  { %408 = vmatpush3.bf16.msra.mxu1 %v439_v14 }
  0x4c   :  { %409 = vmatprep.subr.bf16.mxu1 %v440_v16 }
  0x4d   :  { %390 = vmatpush3.bf16.msra.mxu0 %v432_v11 }
  0x4e   :  { %391 = vmatprep.subr.bf16.mxu0 %v433_v13 }
  0x4f   :  { %410 = vmatpush3.bf16.msra.mxu1 %v440_v16 }
  0x50   :  { %411 = vmatprep.subr.bf16.mxu1 %v441_v20 }
  0x51   :  { %392 = vmatpush3.bf16.msra.mxu0 %v433_v13 }
  0x52   :  { %393 = vmatprep.subr.bf16.mxu0 %v434_v15 }
  0x53   :  { %412 = vmatpush3.bf16.msra.mxu1 %v441_v20 }
  0x54   :  { %413 = vmatprep.subr.bf16.mxu1 %v442_v21 }
  0x55   :  { %394 = vmatpush3.bf16.msra.mxu0 %v434_v15 }
  0x57   :  { %414 = vmatpush3.bf16.msra.mxu1 %v442_v21 }
  0x58   :  { %396 = vmatmul.mubr.bf16.vlgmr.msra.gmra.mrb[0].mxu0 %v68_v19 }
 0x12b   :  { %v397_v23 = vpop.f32.mrb[0].mxu0 }
 0x12c   :  { %v183_v24 = vadd.f32 %v397_v23, %v341_v22  ;;  %v174_v25 = vpop.f32.mrb[1].mxu0 }
 0x12d   :  { %v175_v26 = vadd.f32 %v341_v22, %v174_v25  ;;  %v398_v27 = vpop.f32.mrb[2].mxu0 }
 0x12e   :  { %v186_v28 = vadd.f32 %v398_v27, %v341_v22  ;;  %v177_v29 = vpop.f32.mrb[3].mxu0  ;;  %v191_v31 = vmax.f32 %v183_v24, 0.0 }
 0x12f   :  { %v178_v30 = vadd.f32 %v341_v22, %v177_v29  ;;  %v189_v33 = vmax.f32 %v175_v26, 0.0 }
 0x130   :  { %v192_v32 = vmax.f32 %v186_v28, 0.0 }
 0x131   :  { %v190_v34 = vmax.f32 %v178_v30, 0.0 }
 0x132   :  { %v194_v35 = vpack.c.bf16 %v192_v32, %v191_v31 }
 0x133   :  { %v193_v36 = vpack.c.bf16 %v190_v34, %v189_v33 }
 0x135   :  { %415 = vmatprep.mubr.bf16.mxu1 %v193_v36 }
 0x136   :  { %416 = vmatmul.mubr.bf16.vlgmr.msra.gmra.mrb[0].mxu1 %v194_v35 }
 0x209   :  { %v417_v38 = vpop.f32.mrb[0].mxu1 }
 0x20a   :  { %v309_v39 = vadd.f32 %v417_v38, %v350_v37  ;;  %v300_v40 = vpop.f32.mrb[1].mxu1 }
 0x20b   :  { %v301_v41 = vadd.f32 %v350_v37, %v300_v40  ;;  %v418_v42 = vpop.f32.mrb[2].mxu1 }
 0x20c   :  { %v317_v43 = vmul.f32 %v309_v39, %v65_v17  ;;  %v312_v44 = vadd.f32 %v418_v42, %v350_v37  ;;  %v303_v45 = vpop.f32.mrb[3].mxu1 }
 0x20d   :  { %v315_v46 = vmul.f32 %v301_v41, %v620_v4  ;;  %v304_v47 = vadd.f32 %v350_v37, %v303_v45 }
 0x20e   :  { %321 = vst [vmem:[#allocation8 + $0x10] sm:$0xff] %v317_v43  ;;  %v318_v48 = vmul.f32 %v312_v44, %v66_v18 }
 0x20f   :  { %319 = vst [vmem:[#allocation8] sm:$0xff] %v315_v46  ;;  %v316_v49 = vmul.f32 %v304_v47, %v622_v5 }
 0x210   :  { %322 = vst [vmem:[#allocation8 + $0x18] sm:$0xff] %v318_v48 }
 0x211   :  { %320 = vst [vmem:[#allocation8 + $0x8] sm:$0xff] %v316_v49 }
 0x212   :  { %520 = shalt.err (!%p517_p0)
}
 0x213   :  { %s521_s12 = scalar_lea.hbm %s654_s5, 512 }
 0x214   :  { %p522_p1 = scmp.ne.s32.totalorder %s654_s5, %s521_s12  ;;  %p525_p2 = scmp.lt.u32.totalorder %s521_s12, %s654_s5 }
 0x216   :  { %p527_p3 = pnand %p525_p2, %p522_p1 }
 0x218   :  { %530 = shalt.err (!%p527_p3)
}
 0x219   :  { %334 = dma.vmem_to_hbm [thread:$0]  %s329_s9, 512, %s654_s5, [#allocation4], %s541_s1, %s541_s1, %s542_s17  }
 0x21a   :  { %535 = dma.done.wait [#allocation4], 512  }
 0x21b   :  { %536 = vsyncadd [#allocation4], 4294966784 }
 0x21c   :  { %338 = vsyncpa [#allocation3], 1 }
 0x21d   :  { %339 = vsyncpa [#allocation6], 1 }
 0x21e   :  { %340 = vsyncpa [#allocation4], 1 }

</bundles_post_ra>
